<compile_context>
chip_gen: v6e
topology: v6e:2x2x1
jax: 0.10.0
libtpu: 0.0.40
codegen_flags: <defaults>
</compile_context>

<pallas_src>
import re
import jax
import jax.numpy as jnp
from jax.experimental import pallas as pl
from jax.experimental.pallas import tpu as pltpu


# ---------------------------------------------------------------------------
# Zero-loss value (== torch.tensor([0.0]) in __init__).  No Pallas needed:
# a constant folds away in XLA; cache it so every loss instance shares it.
# ---------------------------------------------------------------------------
_ZERO_LOSS_CACHE = {}


def zero_loss():
    z = _ZERO_LOSS_CACHE.get("z")
    if z is None:
        z = jnp.zeros((1,), jnp.float32)
        _ZERO_LOSS_CACHE["z"] = z
    return z


# ---------------------------------------------------------------------------
# unpacke_low_cams:
#   cams_low: (N, C, H, W), glabel: (N,) int32.
#     support_background=False -> out (N, 1, H, W), out[i,0] = cams[i, gl[i]]
#     support_background=True  -> out (N, 2, H, W),
#         out[i,0] = cams[i, 0], out[i,1] = cams[i, gl[i] + 1]
# Precondition (same as the PyTorch module): 0 <= glabel[i] < C
# (and glabel[i] + 1 < C when support_background).  Out-of-range labels are
# clamped instead of faulting.
# ---------------------------------------------------------------------------

# Below this many gathered elements a Pallas custom call's fixed launch /
# pipeline-prolog cost dominates; XLA's fused gather wins outright.
_PALLAS_MIN_ELEMS = 1 << 16          # 64K elements (256 KiB in f32)

# Cap the double-buffered output block at ~8 MiB so even v7x's scoped VMEM
# has plenty of headroom; v5e/v6e have strictly more slack.
_MAX_OUT_BLOCK_BYTES = 8 << 20


def _xla_unpack_low_cams(cams_low, glabel, support_background):
    """XLA-native gather fallback for tiny problems."""
    c = cams_low.shape[1]
    gl = jnp.clip(glabel.astype(jnp.int32), 0, c - 1)
    if support_background:
        fg = jnp.clip(glabel.astype(jnp.int32) + 1, 0, c - 1)
        idx = jnp.stack([jnp.zeros_like(fg), fg], axis=1)        # (N, 2)
    else:
        idx = gl[:, None]                                        # (N, 1)
    return jnp.take_along_axis(cams_low, idx[:, :, None, None], axis=1)


def _make_gather_kernel(ts, k, c, n, support_background):
    """Per grid step: issue ts*k data-dependent HBM->VMEM DMAs that land
    directly in the output block.  No vreg traffic, no concatenate."""

    def kernel(gl_ref, cams_hbm, out_ref, sem):
        base = pl.program_id(0) * ts
        copies = []
        for t in range(ts):                       # static -> fully unrolled
            # Clamp the tail of the last (partial) tile onto sample n-1:
            # redundant but in-bounds; padded output rows are sliced away.
            i = jnp.minimum(base + t, n - 1)
            lab = gl_ref[i]
            if support_background:
                chans = (0, jnp.clip(lab + 1, 0, c - 1))
            else:
                chans = (jnp.clip(lab, 0, c - 1),)
            for kk, ch in enumerate(chans):
                cp = pltpu.make_async_copy(
                    cams_hbm.at[i * c + ch],      # (HW,) plane in HBM
                    out_ref.at[t, kk],            # row of the output block
                    sem.at[t, kk])
                cp.start()
                copies.append(cp)
        for cp in copies:                         # keep all ts*k DMAs in flight
            cp.wait()

    return kernel


def pallas_unpack_low_cams(cams_low, glabel, support_background=False,
                           use_pallas=None, tile_samples=8):
    n, c, h, w = cams_low.shape
    hw = h * w
    k = 2 if support_background else 1
    itemsize = cams_low.dtype.itemsize

    if use_pallas is None:
        use_pallas = (n * k * hw) >= _PALLAS_MIN_ELEMS
    if not use_pallas:
        return _xla_unpack_low_cams(cams_low, glabel, support_background)

    glabel = glabel.astype(jnp.int32)
    cams2 = cams_low.reshape(n * c, hw)           # free reshape; stays in HBM

    # Batch ts samples per grid step (amortize per-step overhead, keep ts*k
    # DMAs in flight), capped so the double-buffered output block fits VMEM.
    per_sample = k * hw * itemsize
    ts = max(1, min(tile_samples, n,
                    _MAX_OUT_BLOCK_BYTES // max(1, 2 * per_sample)))
    num_tiles = pl.cdiv(n, ts)
    n_pad = num_tiles * ts

    kernel = _make_gather_kernel(ts, k, c, n, support_background)

    out = pl.pallas_call(
        kernel,
        out_shape=jax.ShapeDtypeStruct((n_pad, k, hw), cams_low.dtype),
        grid_spec=pltpu.PrefetchScalarGridSpec(
            num_scalar_prefetch=1,                # glabel -> SMEM
            grid=(num_tiles,),
            in_specs=[pl.BlockSpec(memory_space=pl.ANY)],   # cams stay in HBM
            out_specs=pl.BlockSpec((ts, k, hw), lambda g, gl: (g, 0, 0)),
            scratch_shapes=[pltpu.SemaphoreType.DMA((ts, k))],
        ),
        compiler_params=pltpu.CompilerParams(
            # v7x: only shard across the 2 TensorCores when there are enough
            # tiles to amortize the per-core prolog; no-op on v5e/v6e.
            dimension_semantics=(("parallel",) if num_tiles >= 4
                                 else ("arbitrary",))),
        cost_estimate=pl.CostEstimate(
            flops=0, transcendentals=0,
            bytes_accessed=2 * n * k * hw * itemsize),
    )(glabel, cams2)

    return out[:n].reshape(n, k, h, w)


# ---------------------------------------------------------------------------
# ElementaryLoss re-implementation (JAX / Pallas).
# ---------------------------------------------------------------------------
class ElementaryLoss:
    def __init__(self, name=None, lambda_=1.0, elb=None, logit=False,
                 support_background=False, multi_label_flag=False,
                 sigma_rgb=15.0, sigma_xy=100.0, scale_factor=0.5,
                 start_epoch=None, end_epoch=None, seg_ignore_idx=-255,
                 dataset=None):
        self._name = name
        self.lambda_ = lambda_
        self.elb = elb                      # TODO(synk): ELB module not ported.
        self.logit = logit
        self.support_background = support_background
        assert not multi_label_flag
        self.multi_label_flag = multi_label_flag
        self.sigma_rgb = sigma_rgb
        self.sigma_xy = sigma_xy
        self.scale_factor = scale_factor
        if end_epoch == -1:
            end_epoch = None
        self.start_epoch = start_epoch
        self.end_epoch = end_epoch
        self.c_epoch = 0
        self.loss = None
        # self._zero: cached device constant (== torch.tensor([0.0])).
        self._zero = zero_loss()
        self.seg_ignore_idx = seg_ignore_idx

    def is_on(self, _epoch=None):
        c_epoch = self.c_epoch if _epoch is None else _epoch
        if self.start_epoch is None and self.end_epoch is None:
            return True
        l = [c_epoch, self.start_epoch, self.end_epoch]
        if all(isinstance(z, int) for z in l):
            return self.start_epoch <= c_epoch <= self.end_epoch
        if self.start_epoch is None and isinstance(self.end_epoch, int):
            return c_epoch <= self.end_epoch
        if isinstance(self.start_epoch, int) and self.end_epoch is None:
            return c_epoch >= self.start_epoch
        return False

    def update_t(self):
        # TODO(synk): ELB temperature update not ported (elb is a no-op here).
        pass

    def unpacke_low_cams(self, cams_low, glabel, as_list=False,
                         use_pallas=None):
        # Batched gather (N, k, H, W).  Keep the batched result in hot code;
        # as_list=True reproduces the PyTorch list-of-(1,k,H,W) interface but
        # reintroduces per-slice dispatch overhead.
        stacked = pallas_unpack_low_cams(cams_low, glabel,
                                         self.support_background,
                                         use_pallas=use_pallas)
        if as_list:
            n = cams_low.shape[0]
            return [stacked[i:i + 1] for i in range(n)]
        return stacked

    @property
    def __name__(self):
        if self._name is None:
            name = self.__class__.__name__
            s1 = re.sub('(.)([A-Z][a-z]+)', r'\1_\2', name)
            out = re.sub('([a-z0-9])([A-Z])', r'\1_\2', s1).lower()
            if self.logit:
                out = out + '_logit'
            return out
        return self._name

    def forward(self, epoch=0, model=None, cams_inter=None, fcams=None,
                cl_logits=None, seg_logits=None, glabel=None,
                pseudo_glabel=None, masks=None, raw_img=None, x_in=None,
                im_recon=None, seeds=None, cutmix_holder=None, key_arg=None):
        # Base-class forward: record epoch; no tensor compute; returns None
        # exactly like the PyTorch module.  The "loss is off" value remains
        # available as self._zero for subclasses.
        self.c_epoch = epoch
        return None


# ---------------------------------------------------------------------------
if __name__ == "__main__":
    key = jax.random.PRNGKey(0)
    k1, k2, k3, k4 = jax.random.split(key, 4)

    def ref_unpack(cams, gl, support_background):
        rows = []
        for i in range(cams.shape[0]):
            if support_background:
                rows.append(jnp.stack([cams[i, 0], cams[i, int(gl[i]) + 1]]))
            else:
                rows.append(cams[i, int(gl[i])][None])
        return jnp.stack(rows)

    # ---- forward(): epoch bookkeeping only (matches PyTorch base class) ----
    crit = ElementaryLoss(support_background=False)
    ret = crit.forward(epoch=3)
    assert ret is None
    assert crit.c_epoch == 3 and crit.is_on()
    z = jax.block_until_ready(crit._zero)
    assert z.shape == (1,) and z.dtype == jnp.float32 and float(z[0]) == 0.0

    # ---- case 1: tiny shape (2, 4, 16, 16) ---------------------------------
    N, C, H, W = 2, 4, 16, 16
    cams_small = jax.random.normal(k1, (N, C, H, W), dtype=jnp.float32)
    gl_small = jax.random.randint(k2, (N,), 0, C - 1, dtype=jnp.int32)

    # auto path: below threshold -> XLA take_along_axis fallback
    out_auto = jax.block_until_ready(crit.unpacke_low_cams(cams_small, gl_small))
    assert out_auto.shape == (N, 1, H, W)
    assert jnp.allclose(out_auto, ref_unpack(cams_small, gl_small, False))

    # forced Pallas path on the same tiny shape
    out_pl = jax.block_until_ready(
        crit.unpacke_low_cams(cams_small, gl_small, use_pallas=True))
    assert jnp.allclose(out_pl, ref_unpack(cams_small, gl_small, False))

    # support_background=True (background ch 0 + glabel+1), forced Pallas
    crit_bg = ElementaryLoss(support_background=True)
    out_bg = jax.block_until_ready(
        crit_bg.unpacke_low_cams(cams_small, gl_small, use_pallas=True))
    assert out_bg.shape == (N, 2, H, W)
    assert jnp.allclose(out_bg, ref_unpack(cams_small, gl_small, True))

    # ---- case 2: larger, non-divisible batch (exercises tile clamp) --------
    N2, C2, H2, W2 = 10, 6, 32, 32
    cams_big = jax.random.normal(k3, (N2, C2, H2, W2), dtype=jnp.float32)
    gl_big = jax.random.randint(k4, (N2,), 0, C2 - 1, dtype=jnp.int32)

    out_big = jax.block_until_ready(
        crit.unpacke_low_cams(cams_big, gl_big, use_pallas=True))
    assert out_big.shape == (N2, 1, H2, W2)
    assert jnp.allclose(out_big, ref_unpack(cams_big, gl_big, False))

    out_big_bg = jax.block_until_ready(
        crit_bg.unpacke_low_cams(cams_big, gl_big, use_pallas=True))
    assert out_big_bg.shape == (N2, 2, H2, W2)
    assert jnp.allclose(out_big_bg, ref_unpack(cams_big, gl_big, True))

    # list-style compat path (not for hot code)
    sel_list = jax.block_until_ready(
        crit.unpacke_low_cams(cams_small, gl_small, as_list=True))
    assert len(sel_list) == N and sel_list[0].shape == (1, 1, H, W)
    for i in range(N):
        assert jnp.allclose(sel_list[i][0, 0], cams_small[i, int(gl_small[i])])

    print("KERNEL_OK")
</pallas_src>

<mosaic_0001>
module attributes {stable_mosaic.version = 11 : i64} {
  func.func @kernel(%arg0: i32, %arg1: memref<2xi32, #tpu.memory_space<smem>>, %arg2: memref<8x256xf32, #tpu.memory_space<any>>, %arg3: memref<2x1x256xf32, #tpu.memory_space<vmem>>, %arg4: memref<2x1x!tpu.dma_semaphore, #tpu.memory_space<semaphore_mem>>) attributes {dimension_semantics = [#tpu.dimension_semantics<arbitrary>], iteration_bounds = array<i64: 1>, scalar_prefetch = 1 : i64, scratch_operands = 1 : i64, tpu.core_type = #tpu.core_type<tc>, window_params = [{}, {transform_indices = @transform_1, window_bounds = array<i64: 2, 1, 256>}]} {
    %c2_i32 = arith.constant 2 : i32
    %0 = arith.muli %arg0, %c2_i32 : i32
    %c0_i32 = arith.constant 0 : i32
    %1 = arith.addi %0, %c0_i32 : i32
    %c1_i32 = arith.constant 1 : i32
    %2 = arith.minsi %1, %c1_i32 : i32
    %3 = arith.index_cast %2 : i32 to index
    %4 = memref.load %arg1[%3] : memref<2xi32, #tpu.memory_space<smem>>
    %c0_i32_0 = arith.constant 0 : i32
    %c3_i32 = arith.constant 3 : i32
    %5 = arith.maxsi %c0_i32_0, %4 : i32
    %6 = arith.minsi %c3_i32, %5 : i32
    %c4_i32 = arith.constant 4 : i32
    %7 = arith.muli %2, %c4_i32 : i32
    %8 = arith.addi %7, %6 : i32
    %c0_i32_1 = arith.constant 0 : i32
    %c0_i32_2 = arith.constant 0 : i32
    %c0_i32_3 = arith.constant 0 : i32
    %c0_i32_4 = arith.constant 0 : i32
    %c0_i32_5 = arith.constant 0 : i32
    %9 = tpu.memref_slice %arg2[%8, %c0_i32_5] : memref<8x256xf32, #tpu.memory_space<any>> -> memref<1x256xf32, #tpu.memory_space<any>>
    %10 = tpu.memref_squeeze %9 : memref<1x256xf32, #tpu.memory_space<any>> -> memref<256xf32, #tpu.memory_space<any>>
    %c0_i32_6 = arith.constant 0 : i32
    %11 = tpu.memref_slice %arg3[%c0_i32_1, %c0_i32_2, %c0_i32_6] : memref<2x1x256xf32, #tpu.memory_space<vmem>> -> memref<1x1x256xf32, #tpu.memory_space<vmem>>
    %12 = tpu.memref_squeeze %11 : memref<1x1x256xf32, #tpu.memory_space<vmem>> -> memref<256xf32, #tpu.memory_space<vmem>>
    %13 = tpu.memref_slice %arg4[%c0_i32_3, %c0_i32_4] : memref<2x1x!tpu.dma_semaphore, #tpu.memory_space<semaphore_mem>> -> memref<1x1x!tpu.dma_semaphore, #tpu.memory_space<semaphore_mem>>
    %14 = tpu.memref_squeeze %13 : memref<1x1x!tpu.dma_semaphore, #tpu.memory_space<semaphore_mem>> -> memref<!tpu.dma_semaphore, #tpu.memory_space<semaphore_mem>>
    tpu.enqueue_dma source(%10 : memref<256xf32, #tpu.memory_space<any>>) target(%12 : memref<256xf32, #tpu.memory_space<vmem>>) target_semaphore(%14 : memref<!tpu.dma_semaphore, #tpu.memory_space<semaphore_mem>>)
    %c1_i32_7 = arith.constant 1 : i32
    %15 = arith.addi %0, %c1_i32_7 : i32
    %c1_i32_8 = arith.constant 1 : i32
    %16 = arith.minsi %15, %c1_i32_8 : i32
    %17 = arith.index_cast %16 : i32 to index
    %18 = memref.load %arg1[%17] : memref<2xi32, #tpu.memory_space<smem>>
    %c0_i32_9 = arith.constant 0 : i32
    %c3_i32_10 = arith.constant 3 : i32
    %19 = arith.maxsi %c0_i32_9, %18 : i32
    %20 = arith.minsi %c3_i32_10, %19 : i32
    %c4_i32_11 = arith.constant 4 : i32
    %21 = arith.muli %16, %c4_i32_11 : i32
    %22 = arith.addi %21, %20 : i32
    %c1_i32_12 = arith.constant 1 : i32
    %c0_i32_13 = arith.constant 0 : i32
    %c1_i32_14 = arith.constant 1 : i32
    %c0_i32_15 = arith.constant 0 : i32
    %c0_i32_16 = arith.constant 0 : i32
    %23 = tpu.memref_slice %arg2[%22, %c0_i32_16] : memref<8x256xf32, #tpu.memory_space<any>> -> memref<1x256xf32, #tpu.memory_space<any>>
    %24 = tpu.memref_squeeze %23 : memref<1x256xf32, #tpu.memory_space<any>> -> memref<256xf32, #tpu.memory_space<any>>
    %c0_i32_17 = arith.constant 0 : i32
    %25 = tpu.memref_slice %arg3[%c1_i32_12, %c0_i32_13, %c0_i32_17] : memref<2x1x256xf32, #tpu.memory_space<vmem>> -> memref<1x1x256xf32, #tpu.memory_space<vmem>>
    %26 = tpu.memref_squeeze %25 : memref<1x1x256xf32, #tpu.memory_space<vmem>> -> memref<256xf32, #tpu.memory_space<vmem>>
    %27 = tpu.memref_slice %arg4[%c1_i32_14, %c0_i32_15] : memref<2x1x!tpu.dma_semaphore, #tpu.memory_space<semaphore_mem>> -> memref<1x1x!tpu.dma_semaphore, #tpu.memory_space<semaphore_mem>>
    %28 = tpu.memref_squeeze %27 : memref<1x1x!tpu.dma_semaphore, #tpu.memory_space<semaphore_mem>> -> memref<!tpu.dma_semaphore, #tpu.memory_space<semaphore_mem>>
    tpu.enqueue_dma source(%24 : memref<256xf32, #tpu.memory_space<any>>) target(%26 : memref<256xf32, #tpu.memory_space<vmem>>) target_semaphore(%28 : memref<!tpu.dma_semaphore, #tpu.memory_space<semaphore_mem>>)
    %c0_i32_18 = arith.constant 0 : i32
    %c0_i32_19 = arith.constant 0 : i32
    %c0_i32_20 = arith.constant 0 : i32
    %c0_i32_21 = arith.constant 0 : i32
    %c0_i32_22 = arith.constant 0 : i32
    %29 = tpu.memref_slice %arg2[%8, %c0_i32_22] : memref<8x256xf32, #tpu.memory_space<any>> -> memref<1x256xf32, #tpu.memory_space<any>>
    %30 = tpu.memref_squeeze %29 : memref<1x256xf32, #tpu.memory_space<any>> -> memref<256xf32, #tpu.memory_space<any>>
    %c0_i32_23 = arith.constant 0 : i32
    %31 = tpu.memref_slice %arg3[%c0_i32_18, %c0_i32_19, %c0_i32_23] : memref<2x1x256xf32, #tpu.memory_space<vmem>> -> memref<1x1x256xf32, #tpu.memory_space<vmem>>
    %32 = tpu.memref_squeeze %31 : memref<1x1x256xf32, #tpu.memory_space<vmem>> -> memref<256xf32, #tpu.memory_space<vmem>>
    %33 = tpu.memref_slice %arg4[%c0_i32_20, %c0_i32_21] : memref<2x1x!tpu.dma_semaphore, #tpu.memory_space<semaphore_mem>> -> memref<1x1x!tpu.dma_semaphore, #tpu.memory_space<semaphore_mem>>
    %34 = tpu.memref_squeeze %33 : memref<1x1x!tpu.dma_semaphore, #tpu.memory_space<semaphore_mem>> -> memref<!tpu.dma_semaphore, #tpu.memory_space<semaphore_mem>>
    tpu.wait_dma2 semaphore(%34 : memref<!tpu.dma_semaphore, #tpu.memory_space<semaphore_mem>>) src(%30 : memref<256xf32, #tpu.memory_space<any>>) dst(%32 : memref<256xf32, #tpu.memory_space<vmem>>)
    %c1_i32_24 = arith.constant 1 : i32
    %c0_i32_25 = arith.constant 0 : i32
    %c1_i32_26 = arith.constant 1 : i32
    %c0_i32_27 = arith.constant 0 : i32
    %c0_i32_28 = arith.constant 0 : i32
    %35 = tpu.memref_slice %arg2[%22, %c0_i32_28] : memref<8x256xf32, #tpu.memory_space<any>> -> memref<1x256xf32, #tpu.memory_space<any>>
    %36 = tpu.memref_squeeze %35 : memref<1x256xf32, #tpu.memory_space<any>> -> memref<256xf32, #tpu.memory_space<any>>
    %c0_i32_29 = arith.constant 0 : i32
    %37 = tpu.memref_slice %arg3[%c1_i32_24, %c0_i32_25, %c0_i32_29] : memref<2x1x256xf32, #tpu.memory_space<vmem>> -> memref<1x1x256xf32, #tpu.memory_space<vmem>>
    %38 = tpu.memref_squeeze %37 : memref<1x1x256xf32, #tpu.memory_space<vmem>> -> memref<256xf32, #tpu.memory_space<vmem>>
    %39 = tpu.memref_slice %arg4[%c1_i32_26, %c0_i32_27] : memref<2x1x!tpu.dma_semaphore, #tpu.memory_space<semaphore_mem>> -> memref<1x1x!tpu.dma_semaphore, #tpu.memory_space<semaphore_mem>>
    %40 = tpu.memref_squeeze %39 : memref<1x1x!tpu.dma_semaphore, #tpu.memory_space<semaphore_mem>> -> memref<!tpu.dma_semaphore, #tpu.memory_space<semaphore_mem>>
    tpu.wait_dma2 semaphore(%40 : memref<!tpu.dma_semaphore, #tpu.memory_space<semaphore_mem>>) src(%36 : memref<256xf32, #tpu.memory_space<any>>) dst(%38 : memref<256xf32, #tpu.memory_space<vmem>>)
    return
  }
  func.func @transform_1(%arg0: i32, %arg1: memref<2xi32, #tpu.memory_space<smem>>) -> (i32, i32, i32) {
    %c0_i32 = arith.constant 0 : i32
    %c0_i32_0 = arith.constant 0 : i32
    %c0_i32_1 = arith.constant 0 : i32
    return %arg0, %c0_i32, %c0_i32_0 : i32, i32, i32
  }
}

</mosaic_0001>

<bundles_post_ra>
// kernel: tpu_custom_call.1
= control target key start
LH: loop header
LB: loop body
LE: loop exit
PB: predicated region body
PF: predicated region fallthrough
CT: control target
= control target key end

     0   :  { %s206_s9 = smov [#allocation4]   ;;  %s298_s0 = inlined_call_operand.hbm [shape: s32[2], index: 0, kind: input, shape index: {}]   ;;  %s299_s1 = inlined_call_operand.hbm [shape: f32[8,256], index: 1, kind: input, shape index: {}]   ;;  %s300_s2 = inlined_call_operand.hbm [shape: f32[2,1,256], index: 2, kind: output, shape index: {}]  }
   0x1   :  { %8 = dma.hbm_to_smem %s298_s0, 16, %s206_s9, [#allocation3] }
   0x2   :  { %198 = dma.done.wait [#allocation3], 16 }
   0x3   :  { %199 = vsyncadd [#allocation3], 4294967280 }
   0x4   :  { %10 = sfence }
   0x5   :  { %11 = vsyncpa [#allocation6], 0  ;;  %s15_s12 = sld [smem:[#allocation4]]  ;;  %s207_s14 = smov [#allocation5]  }
   0x6   :  { %s232_s13 = sld [smem:[#allocation4 + $0x1]]  ;;  %s29_s15 = sshll.u32 %s207_s14, 4  ;;  %s234_s15 = int_to_ptr.vmem [resolvable:$true] %s29_s15 }
   0x7   :  { %s136_s27 = scalar_lea.hbm %s299_s1, 256 }
   0xb   :  { %p16_p0 = scmp.gt.s32.totalorder %s15_s12, 0  ;;  %p97_p1 = scmp.lt.s32.totalorder %s15_s12, 3 }
   0xc   :  { %p37_p2 = scmp.gt.s32.totalorder %s232_s13, 0  ;;  %p105_p3 = scmp.lt.s32.totalorder %s232_s13, 3 }
   0xd   :  { %s302_s12 = smov (!%p16_p0, %s15_s12), 0 }
   0xe   :  { %s304_s12 = smov (!%p97_p1, %s302_s12), 3 }
   0xf   :  { %s238_s0 = scalar_select %p37_p2, %s232_s13, 0 }
  0x10   :  { %s22_s16 = sshrl.u32 %s304_s12, 3  ;;  %s23_s17 = sand.u32 7, %s304_s12  }
  0x11   :  { %s102_s18 = sshll.u32 %s22_s16, 4 }
  0x12   :  { %s25_s19 = sadd.s32 %s102_s18, %s23_s17 }
  0x13   :  { %s103_s20 = sshll.u32 %s25_s19, 4 }
  0x14   :  { %s27_s23 = scalar_lea.hbm %s299_s1, %s103_s20 }
  0x15   :  { %s134_s24 = scalar_lea.hbm %s27_s23, 32  ;;  %p137_p5 = scmp.lt.s32.totalorder %s27_s23, %s299_s1 }
  0x16   :  { %p135_p4 = scmp.ne.s32.totalorder %s27_s23, %s134_s24  ;;  %p138_p6 = scmp.lt.s32.totalorder %s136_s27, %s134_s24 }
  0x18   :  { %p139_p7 = por %p138_p6, %p137_p5 }
  0x1a   :  { %p140_p8 = pnand %p139_p7, %p135_p4 }
  0x1c   :  { %143 = shalt.err (!%p140_p8)  }
  0x1d   :  { %s144_s4 = scalar_lea.vmem %s234_s15, 32  ;;  %s257_s5 = scalar_lea.vmem %s234_s15, 64 }
  0x1e   :  { %p145_p9 = scmp.ne.s32.totalorder %s234_s15, %s144_s4  ;;  %p149_p10 = scmp.lt.s32.totalorder %s234_s15, %s234_s15 }
  0x1f   :  { %p150_p11 = scmp.lt.s32.totalorder %s257_s5, %s144_s4 }
  0x21   :  { %p151_p12 = por %p150_p11, %p149_p10 }
  0x23   :  { %p152_p13 = pnand %p151_p12, %p145_p9 }
  0x25   :  { %155 = shalt.err (!%p152_p13)  }
  0x26   :  { %s208_s6 = smov 128   ;;  %s209_s7 = smov 16  }
  0x27   :  { %s210_s8 = smov 1   ;;  %s306_s0 = smov (!%p105_p3, %s238_s0), 3 }
  0x28   :  { %32 = dma.hbm_to_vmem [thread:$0]  %s27_s23, 32, %s234_s15, [#allocation2], %s208_s6, %s209_s7, %s210_s8 }
  0x29   :  { %s42_s9 = sadd.s32 4, %s306_s0  ;;  %s211_s10 = smov [#allocation5 + $0x2]  }
  0x2a   :  { %s52_s11 = sshll.u32 %s211_s10, 4  ;;  %s43_s12 = sshrl.u32 %s42_s9, 3  ;;  %s53_s11 = int_to_ptr.vmem [resolvable:$true] %s52_s11 }
  0x2b   :  { %s44_s14 = sand.u32 7, %s42_s9   ;;  %s110_s16 = sshll.u32 %s43_s12, 4 }
  0x2c   :  { %s46_s17 = sadd.s32 %s110_s16, %s44_s14 }
  0x2d   :  { %s111_s18 = sshll.u32 %s46_s17, 4 }
  0x2e   :  { %s48_s21 = scalar_lea.hbm %s299_s1, %s111_s18 }
  0x2f   :  { %s156_s22 = scalar_lea.hbm %s48_s21, 32  ;;  %p159_p1 = scmp.lt.s32.totalorder %s48_s21, %s299_s1 }
  0x30   :  { %p157_p0 = scmp.ne.s32.totalorder %s48_s21, %s156_s22  ;;  %p160_p2 = scmp.lt.s32.totalorder %s136_s27, %s156_s22 }
  0x32   :  { %p161_p3 = por %p160_p2, %p159_p1 }
  0x34   :  { %p162_p4 = pnand %p161_p3, %p157_p0 }
  0x36   :  { %165 = shalt.err (!%p162_p4)  }
  0x37   :  { %s166_s23 = scalar_lea.vmem %s53_s11, 32  ;;  %p171_p6 = scmp.lt.s32.totalorder %s53_s11, %s234_s15 }
  0x38   :  { %p167_p5 = scmp.ne.s32.totalorder %s53_s11, %s166_s23  ;;  %p172_p7 = scmp.lt.s32.totalorder %s257_s5, %s166_s23 }
  0x3a   :  { %p173_p8 = por %p172_p7, %p171_p6 }
  0x3c   :  { %p174_p9 = pnand %p173_p8, %p167_p5 }
  0x3e   :  { %177 = shalt.err (!%p174_p9)  }
  0x3f   :  { %55 = dma.hbm_to_vmem [thread:$0]  %s48_s21, 32, %s53_s11, [#allocation2 + $0x1], %s208_s6, %s209_s7, %s210_s8 }
  0x40   :  { %200 = dma.done.wait [#allocation2], 32 }
  0x41   :  { %201 = vsyncadd [#allocation2], 4294967264 }
  0x42   :  { %202 = dma.done.wait [#allocation2 + $0x1], 32 }
  0x43   :  { %203 = vsyncadd [#allocation2 + $0x1], 4294967264  ;;  %p179_p11 = scmp.ne.s32.totalorder %s234_s15, %s257_s5  ;;  %p184_p12 = scmp.lt.s32.totalorder %s257_s5, %s257_s5 }
  0x45   :  { %p185_p13 = por %p184_p12, %p149_p10 }
  0x47   :  { %p186_p0 = pnand %p185_p13, %p179_p11 }
  0x49   :  { %189 = shalt.err (!%p186_p0)
}
  0x4a   :  { %s212_s1 = smov 32   ;;  %s213_s26 = smov 2  }
  0x4b   :  { %71 = dma.vmem_to_hbm [thread:$0]  %s234_s15, 64, %s300_s2, [#allocation6], %s212_s1, %s212_s1, %s213_s26  }
  0x4c   :  { %204 = dma.done.wait [#allocation6], 64  }
  0x4d   :  { %205 = vsyncadd [#allocation6], 4294967232 }
  0x4e   :  { %75 = vsyncpa [#allocation6], 1 }
  0x4f   :  { %76 = vsyncmov [#allocation2] }
  0x52   :  { %s77_s29 = vpop.sfrf %76 }
  0x53   :  { %p112_p1 = scmp.ne.s32.totalorder %s77_s29, 0 }
  0x55   :  { %81 = shalt.err (%p112_p1)  }
  0x56   :  { %83 = vsyncmov [#allocation2 + $0x1] }
  0x59   :  { %s84_s30 = vpop.sfrf %83 }
  0x5a   :  { %p113_p2 = scmp.ne.s32.totalorder %s84_s30, 0 }
  0x5c   :  { %88 = shalt.err (%p113_p2)  }

</bundles_post_ra>
